<compile_context>
chip_gen: v7x
topology: tpu7x:2x2x1
jax: 0.10.0
libtpu: 0.0.40
codegen_flags: <defaults>
</compile_context>

<pallas_src>
import jax
import jax.numpy as jnp
from jax.experimental import pallas as pl
from jax.experimental.pallas import tpu as pltpu

EPS = 1e-5          # nn.LayerNorm default eps
NEG_BIG = -1e30     # bias for padded logits -> exp underflows to exactly 0.0


def _round_up(v, m):
    return ((v + m - 1) // m) * m


def _decoder_kernel(x_ref, gamma_ref, beta_ref, w_ref, b_ref, o_ref):
    # x_ref:     (TM, E)         tile of embeddings
    # gamma_ref: (1, E)    f32   LayerNorm weight
    # beta_ref:  (1, E)    f32   LayerNorm bias
    # w_ref:     (E, OUTP)       Linear weight, (in, out) layout, lane-padded
    # b_ref:     (1, OUTP) f32   Linear bias (NEG_BIG in padded lanes)
    # o_ref:     (TM, OUTP)      softmax output (padded lanes hold exact zeros)
    x = x_ref[...].astype(jnp.float32)

    # --- LayerNorm over last dim (f32 on the VPU) ---
    mean = jnp.mean(x, axis=-1, keepdims=True)
    centered = x - mean
    var = jnp.mean(centered * centered, axis=-1, keepdims=True)
    h = centered * jax.lax.rsqrt(var + EPS) * gamma_ref[...] + beta_ref[...]

    # --- Linear on the MXU (weight dtype drives bf16/f32 path), f32 acc ---
    y = jnp.dot(h.astype(w_ref.dtype), w_ref[...],
                preferred_element_type=jnp.float32) + b_ref[...]

    # --- Softmax over last dim; padded lanes are -1e30 -> exp == 0 exactly ---
    y = y - jnp.max(y, axis=-1, keepdims=True)
    e = jnp.exp(y)
    denom = jnp.sum(e, axis=-1, keepdims=True)
    o_ref[...] = (e / denom).astype(o_ref.dtype)   # exact divide: rows sum to 1


def _select_tile_and_vmem(N, E, OUT_pad, x_bytes, w_bytes, out_bytes):
    """Pick the row tile tm and a vmem limit, generation-aware."""
    try:
        cap = pltpu.get_tpu_info().vmem_capacity_bytes
    except Exception:
        cap = 64 * 1024 * 1024            # conservative: v7x per-TC VMEM
    budget = int(cap * 3 // 4)            # leave ~25% headroom

    # HBM traffic per row per grid step (weight/params are resident, not counted).
    row_bytes = E * x_bytes + OUT_pad * out_bytes
    resident = E * OUT_pad * w_bytes + 4 * (2 * E + 2 * OUT_pad)

    def vmem_estimate(tm_):
        return (2 * tm_ * E * x_bytes            # double-buffered x tiles
                + 2 * tm_ * OUT_pad * out_bytes  # double-buffered out tiles
                + resident)                      # resident weight / LN params

    cover = _round_up(max(N, 8), 8)              # one tile covers the batch
    target = 4 * 1024 * 1024                     # >= 4 MiB per step hides step overhead
    tm = max(8, min(cover, _round_up(pl.cdiv(target, row_bytes), 8)))

    # Shrink only if the pipeline would not fit the VMEM budget.
    while tm > 8 and vmem_estimate(tm) > budget:
        tm = max(8, (tm // 16) * 8)

    # v7x has 2 TensorCores: if one tile would cover a *large* batch, split the
    # row axis into >= 2 parallel tiles so the second core is not idle.
    if tm >= cover and N * row_bytes >= 2 * 1024 * 1024:
        tm = max(8, _round_up(pl.cdiv(N, 2), 8))

    vmem_limit = int(min(budget, max(32 * 1024 * 1024,
                                     int(1.5 * vmem_estimate(tm)))))
    return tm, vmem_limit


def make_decoder_linear_norm(gamma, beta, w, b, *, use_bf16_matmul=True,
                             out_dtype=None):
    """Build the forward fn.  gamma/beta: (E,); w: (E, OUT) = torch weight.T; b: (OUT,)."""
    E, OUT = w.shape
    assert gamma.shape == (E,) and beta.shape == (E,) and b.shape == (OUT,)
    OUT_pad = _round_up(OUT, 128)
    w_dtype = jnp.bfloat16 if use_bf16_matmul else jnp.float32

    # Parameter padding / casting hoisted here: done once, not per call.
    w_pad = jnp.zeros((E, OUT_pad), dtype=w_dtype).at[:, :OUT].set(
        w.astype(w_dtype))
    b_pad = jnp.full((1, OUT_pad), NEG_BIG, dtype=jnp.float32).at[0, :OUT].set(
        b.astype(jnp.float32))
    gamma2 = gamma.astype(jnp.float32).reshape(1, E)
    beta2 = beta.astype(jnp.float32).reshape(1, E)

    def apply(x):
        N, E_x = x.shape
        assert E_x == E, "embedding dim mismatch"
        odt = out_dtype if out_dtype is not None else x.dtype
        tm, vmem_limit = _select_tile_and_vmem(
            N, E, OUT_pad,
            jnp.dtype(x.dtype).itemsize,
            jnp.dtype(w_dtype).itemsize,
            jnp.dtype(odt).itemsize)

        out = pl.pallas_call(
            _decoder_kernel,
            out_shape=jax.ShapeDtypeStruct((N, OUT_pad), odt),
            grid_spec=pltpu.PrefetchScalarGridSpec(
                num_scalar_prefetch=0,
                grid=(pl.cdiv(N, tm),),            # ragged N handled by masking
                in_specs=[
                    pl.BlockSpec((tm, E), lambda i: (i, 0)),       # x tile
                    pl.BlockSpec((1, E), lambda i: (0, 0)),        # gamma (resident)
                    pl.BlockSpec((1, E), lambda i: (0, 0)),        # beta  (resident)
                    pl.BlockSpec((E, OUT_pad), lambda i: (0, 0)),  # weight (resident)
                    pl.BlockSpec((1, OUT_pad), lambda i: (0, 0)),  # bias   (resident)
                ],
                out_specs=pl.BlockSpec((tm, OUT_pad), lambda i: (i, 0)),
            ),
            compiler_params=pltpu.CompilerParams(
                dimension_semantics=("parallel",),
                vmem_limit_bytes=vmem_limit),
        )(x, gamma2, beta2, w_pad, b_pad)
        return out[:, :OUT]

    return apply


def decoder_linear_norm(x, gamma, beta, w, b, **kwargs):
    """One-shot convenience wrapper (params re-padded each call)."""
    return make_decoder_linear_norm(gamma, beta, w, b, **kwargs)(x)


def _reference(x, gamma, beta, w, b):
    mean = jnp.mean(x, axis=-1, keepdims=True)
    var = jnp.mean((x - mean) ** 2, axis=-1, keepdims=True)
    h = (x - mean) / jnp.sqrt(var + EPS) * gamma + beta
    y = h @ w + b
    return jax.nn.softmax(y, axis=1)


if __name__ == "__main__":
    key = jax.random.PRNGKey(0)
    N, E, OUT = 8, 32, 2  # batch=8 rows, embedding_dim=32, output_dim=2

    k_x, k_g, k_bt, k_w, k_b, k_x2 = jax.random.split(key, 6)
    x = jax.random.normal(k_x, (N, E), dtype=jnp.float32)
    gamma = 1.0 + 0.05 * jax.random.normal(k_g, (E,), dtype=jnp.float32)
    beta = 0.05 * jax.random.normal(k_bt, (E,), dtype=jnp.float32)
    w = 0.1 * jax.random.normal(k_w, (E, OUT), dtype=jnp.float32)  # (in, out)
    b = 0.1 * jax.random.normal(k_b, (OUT,), dtype=jnp.float32)

    ref = _reference(x, gamma, beta, w, b)

    # bf16-MXU fast path (default); params padded/cast once via the factory.
    fwd = make_decoder_linear_norm(gamma, beta, w, b)
    out_bf16 = jax.block_until_ready(fwd(x))
    assert out_bf16.shape == (N, OUT)
    assert jnp.allclose(out_bf16, ref, atol=2e-2, rtol=2e-2)
    # Exact normalization now (no approximate reciprocal).
    assert jnp.allclose(out_bf16.sum(axis=1), 1.0, atol=1e-4)

    # f32-MXU path: tight tolerance against the reference.
    fwd_f32 = make_decoder_linear_norm(gamma, beta, w, b, use_bf16_matmul=False)
    out_f32 = jax.block_until_ready(fwd_f32(x))
    assert jnp.allclose(out_f32, ref, atol=1e-4, rtol=1e-4)
    assert jnp.allclose(out_f32.sum(axis=1), 1.0, atol=1e-4)

    # Ragged batch exercises the cdiv grid + masked boundary block (no jnp.pad).
    N2 = 13
    x2 = jax.random.normal(k_x2, (N2, E), dtype=jnp.float32)
    out2 = jax.block_until_ready(fwd(x2))
    ref2 = _reference(x2, gamma, beta, w, b)
    assert out2.shape == (N2, OUT)
    assert jnp.allclose(out2, ref2, atol=2e-2, rtol=2e-2)
    assert jnp.allclose(out2.sum(axis=1), 1.0, atol=1e-4)

    print("KERNEL_OK")
</pallas_src>

<mosaic_0001>
module attributes {stable_mosaic.version = 11 : i64} {
  func.func @_decoder_kernel(%arg0: i32, %arg1: memref<8x32xf32, #tpu.memory_space<vmem>>, %arg2: memref<1x32xf32, #tpu.memory_space<vmem>>, %arg3: memref<1x32xf32, #tpu.memory_space<vmem>>, %arg4: memref<32x128xbf16, #tpu.memory_space<vmem>>, %arg5: memref<1x128xf32, #tpu.memory_space<vmem>>, %arg6: memref<8x128xf32, #tpu.memory_space<vmem>>) attributes {dimension_semantics = [#tpu.dimension_semantics<parallel>], iteration_bounds = array<i64: 1>, scalar_prefetch = 0 : i64, scratch_operands = 0 : i64, tpu.core_type = #tpu.core_type<tc>, window_params = [{transform_indices = @transform_0, window_bounds = array<i64: 8, 32>}, {pipeline_mode = #tpu.pipeline_mode<synchronous>, transform_indices = @transform_1, window_bounds = array<i64: 1, 32>}, {pipeline_mode = #tpu.pipeline_mode<synchronous>, transform_indices = @transform_2, window_bounds = array<i64: 1, 32>}, {pipeline_mode = #tpu.pipeline_mode<synchronous>, transform_indices = @transform_3, window_bounds = array<i64: 32, 128>}, {pipeline_mode = #tpu.pipeline_mode<synchronous>, transform_indices = @transform_4, window_bounds = array<i64: 1, 128>}, {transform_indices = @transform_5, window_bounds = array<i64: 8, 128>}]} {
    %c0 = arith.constant 0 : index
    %c0_0 = arith.constant 0 : index
    %0 = vector.load %arg1[%c0, %c0_0] : memref<8x32xf32, #tpu.memory_space<vmem>>, vector<8x32xf32>
    %cst = arith.constant dense<0.000000e+00> : vector<8xf32>
    %1 = vector.multi_reduction <add>, %0, %cst [1] : vector<8x32xf32> to vector<8xf32>
    %2 = vector.shape_cast %1 : vector<8xf32> to vector<8x1xf32>
    %cst_1 = arith.constant 3.200000e+01 : f32
    %3 = vector.broadcast %cst_1 : f32 to vector<8x1xf32>
    %4 = arith.divf %2, %3 : vector<8x1xf32>
    %5 = vector.broadcast %4 : vector<8x1xf32> to vector<8x32xf32>
    %6 = arith.subf %0, %5 : vector<8x32xf32>
    %7 = arith.mulf %6, %6 : vector<8x32xf32>
    %cst_2 = arith.constant dense<0.000000e+00> : vector<8xf32>
    %8 = vector.multi_reduction <add>, %7, %cst_2 [1] : vector<8x32xf32> to vector<8xf32>
    %9 = vector.shape_cast %8 : vector<8xf32> to vector<8x1xf32>
    %cst_3 = arith.constant 3.200000e+01 : f32
    %10 = vector.broadcast %cst_3 : f32 to vector<8x1xf32>
    %11 = arith.divf %9, %10 : vector<8x1xf32>
    %cst_4 = arith.constant 9.99999974E-6 : f32
    %12 = vector.broadcast %cst_4 : f32 to vector<8x1xf32>
    %13 = arith.addf %11, %12 : vector<8x1xf32>
    %14 = math.rsqrt %13 : vector<8x1xf32>
    %15 = vector.broadcast %14 : vector<8x1xf32> to vector<8x32xf32>
    %16 = arith.mulf %6, %15 : vector<8x32xf32>
    %c0_5 = arith.constant 0 : index
    %c0_6 = arith.constant 0 : index
    %17 = vector.load %arg2[%c0_5, %c0_6] : memref<1x32xf32, #tpu.memory_space<vmem>>, vector<1x32xf32>
    %18 = vector.broadcast %17 : vector<1x32xf32> to vector<8x32xf32>
    %19 = arith.mulf %16, %18 : vector<8x32xf32>
    %c0_7 = arith.constant 0 : index
    %c0_8 = arith.constant 0 : index
    %20 = vector.load %arg3[%c0_7, %c0_8] : memref<1x32xf32, #tpu.memory_space<vmem>>, vector<1x32xf32>
    %21 = vector.broadcast %20 : vector<1x32xf32> to vector<8x32xf32>
    %22 = arith.addf %19, %21 : vector<8x32xf32>
    %23 = arith.truncf %22 : vector<8x32xf32> to vector<8x32xbf16>
    %c0_9 = arith.constant 0 : index
    %c0_10 = arith.constant 0 : index
    %24 = vector.load %arg4[%c0_9, %c0_10] : memref<32x128xbf16, #tpu.memory_space<vmem>>, vector<32x128xbf16>
    %cst_11 = arith.constant dense<0.000000e+00> : vector<8x128xf32>
    %25 = tpu.matmul %23, %24, %cst_11 {dimension_numbers = #tpu.dot_dimension_numbers<[1], [0], [0], [1], [0, 0, 1, 1], [], []>} : vector<8x32xbf16>, vector<32x128xbf16>, vector<8x128xf32> -> vector<8x128xf32>
    %c0_12 = arith.constant 0 : index
    %c0_13 = arith.constant 0 : index
    %26 = vector.load %arg5[%c0_12, %c0_13] : memref<1x128xf32, #tpu.memory_space<vmem>>, vector<1x128xf32>
    %27 = vector.broadcast %26 : vector<1x128xf32> to vector<8x128xf32>
    %28 = arith.addf %25, %27 : vector<8x128xf32>
    %cst_14 = arith.constant dense<0xFF800000> : vector<8xf32>
    %29 = vector.multi_reduction <maximumf>, %28, %cst_14 [1] : vector<8x128xf32> to vector<8xf32>
    %30 = vector.shape_cast %29 : vector<8xf32> to vector<8x1xf32>
    %31 = vector.broadcast %30 : vector<8x1xf32> to vector<8x128xf32>
    %32 = arith.subf %28, %31 : vector<8x128xf32>
    %33 = math.exp %32 : vector<8x128xf32>
    %cst_15 = arith.constant dense<0.000000e+00> : vector<8xf32>
    %34 = vector.multi_reduction <add>, %33, %cst_15 [1] : vector<8x128xf32> to vector<8xf32>
    %35 = vector.shape_cast %34 : vector<8xf32> to vector<8x1xf32>
    %36 = vector.broadcast %35 : vector<8x1xf32> to vector<8x128xf32>
    %37 = arith.divf %33, %36 : vector<8x128xf32>
    %c0_16 = arith.constant 0 : index
    %c0_17 = arith.constant 0 : index
    %38 = vector.load %arg6[%c0_16, %c0_17] : memref<8x128xf32, #tpu.memory_space<vmem>>, vector<8x128xf32>
    tpu.vector_store %arg6[%c0_16, %c0_17], %37 {strides = array<i32>} : memref<8x128xf32, #tpu.memory_space<vmem>>, vector<8x128xf32>,
    return
  }
  func.func @transform_0(%arg0: i32) -> (i32, i32) {
    %c0_i32 = arith.constant 0 : i32
    %c0_i32_0 = arith.constant 0 : i32
    return %arg0, %c0_i32 : i32, i32
  }
  func.func @transform_1(%arg0: i32) -> (i32, i32) {
    %c0_i32 = arith.constant 0 : i32
    %c0_i32_0 = arith.constant 0 : i32
    %c0_i32_1 = arith.constant 0 : i32
    return %c0_i32, %c0_i32_0 : i32, i32
  }
  func.func @transform_2(%arg0: i32) -> (i32, i32) {
    %c0_i32 = arith.constant 0 : i32
    %c0_i32_0 = arith.constant 0 : i32
    %c0_i32_1 = arith.constant 0 : i32
    return %c0_i32, %c0_i32_0 : i32, i32
  }
  func.func @transform_3(%arg0: i32) -> (i32, i32) {
    %c0_i32 = arith.constant 0 : i32
    %c0_i32_0 = arith.constant 0 : i32
    %c0_i32_1 = arith.constant 0 : i32
    return %c0_i32, %c0_i32_0 : i32, i32
  }
  func.func @transform_4(%arg0: i32) -> (i32, i32) {
    %c0_i32 = arith.constant 0 : i32
    %c0_i32_0 = arith.constant 0 : i32
    %c0_i32_1 = arith.constant 0 : i32
    return %c0_i32, %c0_i32_0 : i32, i32
  }
  func.func @transform_5(%arg0: i32) -> (i32, i32) {
    %c0_i32 = arith.constant 0 : i32
    %c0_i32_0 = arith.constant 0 : i32
    return %arg0, %c0_i32 : i32, i32
  }
}

</mosaic_0001>

<bundles_post_ra>
// kernel: tpu_custom_call.1
= control target key start
LH: loop header
LB: loop body
LE: loop exit
PB: predicated region body
PF: predicated region fallthrough
CT: control target
= control target key end

     0   :  { %10 = vsyncpa [#allocation3], 0  ;;  %s369_s0 = inlined_call_operand.hbm [shape: f32[8,32], index: 0, kind: input, shape index: {}]   ;;  %s370_s1 = inlined_call_operand.vmem [shape: f32[1,32], index: 1, kind: input, shape index: {}]   ;;  %s371_s2 = inlined_call_operand.vmem [shape: f32[1,32], index: 2, kind: input, shape index: {}]   ;;  %s372_s3 = inlined_call_operand.hbm [shape: bf16[32,128], index: 3, kind: input, shape index: {}]   ;;  %s373_s4 = inlined_call_operand.vmem [shape: f32[1,128], index: 4, kind: input, shape index: {}]   ;;  %s374_s5 = inlined_call_operand.hbm [shape: f32[8,128], index: 5, kind: output, shape index: {}]  }
   0x1   :  { %11 = vsyncpa [#allocation6], 0 }
   0x2   :  { %12 = vsyncpa [#allocation4], 0  ;;  %s277_s18 = smov [#allocation2]   ;;  %s278_s20 = smov [#allocation5]  }
   0x3   :  { %s19_s19 = sshll.u32 %s277_s18, 4  ;;  %s32_s21 = sshll.u32 %s278_s20, 4  ;;  %s20_s19 = int_to_ptr.vmem [resolvable:$true] %s19_s19  ;;  %s314_s21 = int_to_ptr.vmem [resolvable:$true] %s32_s21 }
   0x4   :  { %s205_s24 = scalar_lea.hbm %s369_s0, 128 }
   0x5   :  { %p206_p0 = scmp.ne.s32.totalorder %s369_s0, %s205_s24  ;;  %p209_p1 = scmp.lt.u32.totalorder %s205_s24, %s369_s0 }
   0x7   :  { %p211_p2 = pnand %p209_p1, %p206_p0 }
   0x9   :  { %214 = shalt.err (!%p211_p2)
}
   0xa   :  { %s215_s29 = scalar_lea.vmem %s20_s19, 128  ;;  %p220_p4 = scmp.lt.s32.totalorder %s20_s19, %s20_s19 }
   0xb   :  { %p216_p3 = scmp.ne.s32.totalorder %s20_s19, %s215_s29  ;;  %p221_p5 = scmp.lt.s32.totalorder %s215_s29, %s215_s29 }
   0xd   :  { %p222_p6 = por %p221_p5, %p220_p4 }
   0xf   :  { %p223_p7 = pnand %p222_p6, %p216_p3 }
  0x11   :  { %226 = shalt.err (!%p223_p7)
}
  0x12   :  { %22 = dma.hbm_to_vmem [thread:$0]  %s369_s0, 128, %s20_s19, [#allocation3]  }
  0x13   :  { %s227_s9 = scalar_lea.hbm %s372_s3, 256 }
  0x14   :  { %p228_p8 = scmp.ne.s32.totalorder %s372_s3, %s227_s9  ;;  %p231_p9 = scmp.lt.u32.totalorder %s227_s9, %s372_s3 }
  0x16   :  { %p233_p10 = pnand %p231_p9, %p228_p8 }
  0x18   :  { %236 = shalt.err (!%p233_p10)
}
  0x19   :  { %s237_s14 = scalar_lea.vmem %s314_s21, 256  ;;  %p242_p12 = scmp.lt.s32.totalorder %s314_s21, %s314_s21 }
  0x1a   :  { %p238_p11 = scmp.ne.s32.totalorder %s314_s21, %s237_s14  ;;  %p243_p13 = scmp.lt.s32.totalorder %s237_s14, %s237_s14 }
  0x1c   :  { %p244_p0 = por %p243_p13, %p242_p12 }
  0x1e   :  { %p245_p1 = pnand %p244_p0, %p238_p11 }
  0x20   :  { %248 = shalt.err (!%p245_p1)
}
  0x21   :  { %s279_s0 = smov 64   ;;  %s280_s15 = smov 4  }
  0x22   :  { %38 = dma.hbm_to_vmem [thread:$0]  %s372_s3, 256, %s314_s21, [#allocation6], %s279_s0, %s279_s0, %s280_s15  }
  0x23   :  { %271 = dma.done.wait [#allocation3], 128  }
  0x24   :  { %272 = vsyncadd [#allocation3], 4294967168 }
  0x25   :  { %273 = dma.done.wait [#allocation6], 256  }
  0x26   :  { %274 = vsyncadd [#allocation6], 4294967040  ;;  %vm49_vm0 = vcmask 261120   ;;  %v48_v0 = vld [vmem:[#allocation2] sm:$0xff]  ;;  %v197_v7 = vld [vmem:[#allocation5] sm:$0xff]   ;;  %v281_v8 = vmov 0.0  }
  0x27   :  { %v50_v1 = vsel %vm49_vm0, %v48_v0, 0.0  ;;  %182 = vmatprep.subr.bf16.mxu0 %v281_v8  ;;  %v198_v9 = vld [vmem:[#allocation5 + $0x8] sm:$0xff]   ;;  %vm282_vm1 = vmmov 0   ;;  %v173_v14 = vld [vmem:[%s370_s1] ss:$0 sm:$0xff]  ;;  %s283_s1 = smov [#allocation7]  }
  0x28   :  { %51 = vadd.xlane.f32.xlu0 %v50_v1  ;;  %183 = vmatpush3.bf16.msra.mxu0 %v197_v7  ;;  %v174_v16 = vld [vmem:[%s371_s2] ss:$0 sm:$0xff]  ;;  %s163_s2 = sshll.u32 %s283_s1, 4  ;;  %s164_s2 = int_to_ptr.vmem [resolvable:$true] %s163_s2 }
  0x29   :  { %186 = vmatprep.mubr.msk.bf16.mxu0 %vm282_vm1, %v281_v8  ;;  %184 = vmatprep.subr.bf16.mxu0 %v281_v8  ;;  %v175_v20 = vld [vmem:[%s373_s4] ss:$0 sm:$0xff]  ;;  %s249_s4 = scalar_lea.vmem %s164_s2, 128  ;;  %p254_p3 = scmp.lt.s32.totalorder %s164_s2, %s164_s2 }
  0x2a   :  { %p250_p2 = scmp.ne.s32.totalorder %s164_s2, %s249_s4  ;;  %p255_p4 = scmp.lt.s32.totalorder %s249_s4, %s249_s4 }
  0x2c   :  { %185 = vmatpush3.bf16.msra.mxu0 %v198_v9  ;;  %p256_p5 = por %p255_p4, %p254_p3 }
  0x2e   :  { %p257_p6 = pnand %p256_p5, %p250_p2 }
  0xb5   :  { %v52_v2 = vpop.xlane.xlu0 %51 }
  0xb6   :  { %v54_v3 = vmul.f32 0.03125, %v52_v2 }
  0xb8   :  { %v55_v4 = vsub.f32 %v48_v0, %v54_v3 }
  0xba   :  { %v56_v5 = vmul.f32 %v55_v4, %v55_v4 }
  0xbc   :  { %v57_v6 = vsel %vm49_vm0, %v56_v5, 0.0 }
  0xbd   :  { %58 = vadd.xlane.f32.xlu0 %v57_v6 }
 0x14a   :  { %v59_v10 = vpop.xlane.xlu0 %58 }
 0x14b   :  { %v60_v11 = vmul.f32 0.03125, %v59_v10 }
 0x14d   :  { %v61_v12 = vadd.f32 1e-05, %v60_v11 }
 0x14f   :  { %199 = vrsqrt.f32 %v61_v12 }
 0x159   :  { %v200_v13 = vpop.eup %199 }
 0x15a   :  { %v63_v15 = vmul.f32 %v200_v13, %v55_v4 }
 0x15c   :  { %v71_v17 = vmul.f32 %v173_v14, %v63_v15 }
 0x15e   :  { %v79_v18 = vadd.f32 %v174_v16, %v71_v17 }
 0x160   :  { %v80_v19 = vpack.c.bf16 %v79_v18, %v79_v18 }
 0x162   :  { %187 = vmatmul.mubr.msk.bf16.vlgmr.msra.gmra.mrb[0].mxu0 %vm49_vm0, %v80_v19 }
 0x235   :  { %v141_v21 = vpop.f32.mrb[0].mxu0 }
 0x236   :  { %v142_v22 = vadd.f32 %v175_v20, %v141_v21  ;;  %v188_v23 = vpop.f32.mrb[1].mxu0 }
 0x237   :  { %v144_v24 = vpop.f32.mrb[2].mxu0 }
 0x238   :  { %147 = vmax.xlane.f32.xlu1 %v142_v22  ;;  %v189_v25 = vpop.f32.mrb[3].mxu0 }
 0x2c5   :  { %v148_v26 = vpop.xlane.xlu1 %147 }
 0x2c6   :  { %v149_v27 = vsub.f32 %v142_v22, %v148_v26 }
 0x2c8   :  { %v150_v28 = vmul.f32 1.442695, %v149_v27 }
 0x2ca   :  { %201 = vpow2.f32 %v150_v28 }
 0x2d4   :  { %v202_v29 = vpop.eup %201 }
 0x2d5   :  { %152 = vadd.xlane.f32.xlu1 %v202_v29 }
 0x362   :  { %v153_v30 = vpop.xlane.xlu1 %152 }
 0x363   :  { %203 = vrcp.f32 %v153_v30 }
 0x36d   :  { %v204_v31 = vpop.eup %203 }
 0x36e   :  { %v155_v32 = vmul.f32 %v204_v31, %v202_v29 }
 0x370   :  { %156 = vst [vmem:[#allocation7] sm:$0xff] %v155_v32 }
 0x371   :  { %260 = shalt.err (!%p257_p6)
}
 0x372   :  { %s261_s25 = scalar_lea.hbm %s374_s5, 128 }
 0x373   :  { %p262_p7 = scmp.ne.s32.totalorder %s374_s5, %s261_s25  ;;  %p265_p8 = scmp.lt.u32.totalorder %s261_s25, %s374_s5 }
 0x375   :  { %p267_p9 = pnand %p265_p8, %p262_p7 }
 0x377   :  { %270 = shalt.err (!%p267_p9)
}
 0x378   :  { %166 = dma.vmem_to_hbm [thread:$0]  %s164_s2, 128, %s374_s5, [#allocation4]  }
 0x379   :  { %275 = dma.done.wait [#allocation4], 128  }
 0x37a   :  { %276 = vsyncadd [#allocation4], 4294967168 }
 0x37b   :  { %170 = vsyncpa [#allocation3], 1 }
 0x37c   :  { %171 = vsyncpa [#allocation6], 1 }
 0x37d   :  { %172 = vsyncpa [#allocation4], 1 }

</bundles_post_ra>
